<compile_context>
chip_gen: v7x
topology: tpu7x:2x2x1
jax: 0.10.0
libtpu: 0.0.40
codegen_flags: <defaults>
</compile_context>

<pallas_src>
import jax
import jax.numpy as jnp
from jax.experimental import pallas as pl
from jax.experimental.pallas import tpu as pltpu

LN_EPS = 1e-5   # torch.nn.LayerNorm default eps


def _round_up(n, m):
    return ((n + m - 1) // m) * m


def _layernorm(x, gamma, beta):
    # LayerNorm over the last (feature) axis, biased variance, like torch.
    mean = jnp.mean(x, axis=-1, keepdims=True)
    centered = x - mean
    var = jnp.mean(centered * centered, axis=-1, keepdims=True)
    inv = jax.lax.rsqrt(var + LN_EPS)
    return centered * inv * gamma + beta


def mlp_kernel(x_ref,
               w1_ref, b1_ref, g1_ref, be1_ref,
               w2_ref, b2_ref, g2_ref, be2_ref,
               w3_ref, b3_ref,
               o_ref):
    x = x_ref[...].astype(jnp.float32)

    # Hidden layer 1: Linear -> LayerNorm -> ReLU   (weights are (in, out))
    h = jnp.dot(x, w1_ref[...], preferred_element_type=jnp.float32) + b1_ref[...]
    h = jnp.maximum(_layernorm(h, g1_ref[...], be1_ref[...]), 0.0)

    # Hidden layer 2: Linear -> LayerNorm -> ReLU
    h = jnp.dot(h, w2_ref[...], preferred_element_type=jnp.float32) + b2_ref[...]
    h = jnp.maximum(_layernorm(h, g2_ref[...], be2_ref[...]), 0.0)

    # Output layer: Linear, stored at true output width.
    out = jnp.dot(h, w3_ref[...], preferred_element_type=jnp.float32) + b3_ref[...]
    o_ref[...] = out.astype(o_ref.dtype)


def prepare_params(params):
    """One-time layout prep, hoisted out of the per-forward path:
    transpose PyTorch (out, in) Linear weights to (in, out)."""
    return dict(
        w1=jnp.asarray(params["w1"].T), b1=params["b1"],
        g1=params["g1"], be1=params["be1"],
        w2=jnp.asarray(params["w2"].T), b2=params["b2"],
        g2=params["g2"], be2=params["be2"],
        w3=jnp.asarray(params["w3"].T), b3=params["b3"],
    )


def _weight_spec(arr, single_buffer):
    ndim = arr.ndim
    # Grid-invariant: same (0, ..., 0) block every step -> stays VMEM-resident.
    if single_buffer:
        return pl.BlockSpec(arr.shape, lambda i: (0,) * ndim,
                            pipeline_mode=pl.Buffered(1))
    return pl.BlockSpec(arr.shape, lambda i: (0,) * ndim)


def mlp_forward(x, prepped, *, batch_tile=4096):
    """x: (B, input_size) f32.  prepped: output of prepare_params()."""
    B, in_size = x.shape
    out_size = prepped["w3"].shape[1]

    # Row tile: multiple of 8, <= batch_tile, and capped so the grid keeps
    # >= ~4 steps (lets the "parallel" batch axis shard across both v7x TCs).
    tile = min(batch_tile, _round_up(pl.cdiv(B, 4), 8))
    tile = max(8, (tile // 8) * 8)

    weight_args = [prepped["w1"], prepped["b1"], prepped["g1"], prepped["be1"],
                   prepped["w2"], prepped["b2"], prepped["g2"], prepped["be2"],
                   prepped["w3"], prepped["b3"]]

    def build(single_buffer_weights):
        in_specs = [pl.BlockSpec((tile, in_size), lambda i: (i, 0))]
        in_specs += [_weight_spec(a, single_buffer_weights) for a in weight_args]
        out_spec = pl.BlockSpec((tile, out_size), lambda i: (i, 0))
        return pl.pallas_call(
            mlp_kernel,
            out_shape=jax.ShapeDtypeStruct((B, out_size), jnp.float32),
            grid_spec=pltpu.PrefetchScalarGridSpec(
                num_scalar_prefetch=0,
                grid=(pl.cdiv(B, tile),),
                in_specs=in_specs,
                out_specs=out_spec,
            ),
            compiler_params=pltpu.CompilerParams(
                dimension_semantics=("parallel",)),
        )

    try:
        # Preferred: single-buffered grid-invariant weight blocks (micro-win:
        # less VMEM + one fewer prologue DMA chain).
        out = jax.block_until_ready(build(True)(x, *weight_args))
    except Exception:
        # Fallback if this JAX build rejects Buffered(1) on a pallas_call spec.
        out = build(False)(x, *weight_args)
    return out


def init_params(key, input_size, hidden_sizes, output_size):
    """Deterministic synthetic init (PyTorch-Linear-style uniform ranges)."""
    h1, h2 = hidden_sizes
    keys = jax.random.split(key, 3)

    def lin(k, out_f, in_f):
        bound = 1.0 / jnp.sqrt(jnp.float32(in_f))
        kw, kb = jax.random.split(k)
        w = jax.random.uniform(kw, (out_f, in_f), jnp.float32, -bound, bound)
        b = jax.random.uniform(kb, (1, out_f), jnp.float32, -bound, bound)
        return w, b

    w1, b1 = lin(keys[0], h1, input_size)
    w2, b2 = lin(keys[1], h2, h1)
    w3, b3 = lin(keys[2], output_size, h2)
    return dict(
        w1=w1, b1=b1, g1=jnp.ones((1, h1), jnp.float32), be1=jnp.zeros((1, h1), jnp.float32),
        w2=w2, b2=b2, g2=jnp.ones((1, h2), jnp.float32), be2=jnp.zeros((1, h2), jnp.float32),
        w3=w3, b3=b3,
    )


def mlp_reference(x, p):
    def ln(h, g, b):
        m = jnp.mean(h, axis=-1, keepdims=True)
        c = h - m
        v = jnp.mean(c * c, axis=-1, keepdims=True)
        return c * jax.lax.rsqrt(v + LN_EPS) * g + b

    h = jnp.maximum(ln(x @ p["w1"].T + p["b1"], p["g1"], p["be1"]), 0.0)
    h = jnp.maximum(ln(h @ p["w2"].T + p["b2"], p["g2"], p["be2"]), 0.0)
    return h @ p["w3"].T + p["b3"]


if __name__ == "__main__":
    INPUT_SIZE = 16
    HIDDEN_SIZES = [32, 32]
    OUTPUT_SIZE = 8
    BATCH = 64   # small demo batch; tile clamps to keep a multi-step grid

    key = jax.random.PRNGKey(0)
    kx, kp = jax.random.split(key)
    x = jax.random.normal(kx, (BATCH, INPUT_SIZE), jnp.float32)
    params = init_params(kp, INPUT_SIZE, HIDDEN_SIZES, OUTPUT_SIZE)

    prepped = prepare_params(params)            # one-time weight layout prep
    out = mlp_forward(x, prepped)
    out = jax.block_until_ready(out)

    ref = mlp_reference(x, params)
    assert out.shape == (BATCH, OUTPUT_SIZE)
    assert jnp.allclose(out, ref, atol=1e-4, rtol=1e-4), "mismatch vs reference"

    print("KERNEL_OK")
</pallas_src>

<mosaic_0001>
module attributes {stable_mosaic.version = 11 : i64} {
  func.func @mlp_kernel(%arg0: i32, %arg1: memref<16x16xf32, #tpu.memory_space<vmem>>, %arg2: memref<16x32xf32, #tpu.memory_space<vmem>>, %arg3: memref<1x32xf32, #tpu.memory_space<vmem>>, %arg4: memref<1x32xf32, #tpu.memory_space<vmem>>, %arg5: memref<1x32xf32, #tpu.memory_space<vmem>>, %arg6: memref<32x32xf32, #tpu.memory_space<vmem>>, %arg7: memref<1x32xf32, #tpu.memory_space<vmem>>, %arg8: memref<1x32xf32, #tpu.memory_space<vmem>>, %arg9: memref<1x32xf32, #tpu.memory_space<vmem>>, %arg10: memref<32x8xf32, #tpu.memory_space<vmem>>, %arg11: memref<1x8xf32, #tpu.memory_space<vmem>>, %arg12: memref<16x8xf32, #tpu.memory_space<vmem>>) attributes {dimension_semantics = [#tpu.dimension_semantics<parallel>], iteration_bounds = array<i64: 4>, scalar_prefetch = 0 : i64, scratch_operands = 0 : i64, tpu.core_type = #tpu.core_type<tc>, window_params = [{transform_indices = @transform_0, window_bounds = array<i64: 16, 16>}, {pipeline_mode = #tpu.pipeline_mode<synchronous>, transform_indices = @transform_1, window_bounds = array<i64: 16, 32>}, {pipeline_mode = #tpu.pipeline_mode<synchronous>, transform_indices = @transform_2, window_bounds = array<i64: 1, 32>}, {pipeline_mode = #tpu.pipeline_mode<synchronous>, transform_indices = @transform_3, window_bounds = array<i64: 1, 32>}, {pipeline_mode = #tpu.pipeline_mode<synchronous>, transform_indices = @transform_4, window_bounds = array<i64: 1, 32>}, {pipeline_mode = #tpu.pipeline_mode<synchronous>, transform_indices = @transform_5, window_bounds = array<i64: 32, 32>}, {pipeline_mode = #tpu.pipeline_mode<synchronous>, transform_indices = @transform_6, window_bounds = array<i64: 1, 32>}, {pipeline_mode = #tpu.pipeline_mode<synchronous>, transform_indices = @transform_7, window_bounds = array<i64: 1, 32>}, {pipeline_mode = #tpu.pipeline_mode<synchronous>, transform_indices = @transform_8, window_bounds = array<i64: 1, 32>}, {pipeline_mode = #tpu.pipeline_mode<synchronous>, transform_indices = @transform_9, window_bounds = array<i64: 32, 8>}, {pipeline_mode = #tpu.pipeline_mode<synchronous>, transform_indices = @transform_10, window_bounds = array<i64: 1, 8>}, {transform_indices = @transform_11, window_bounds = array<i64: 16, 8>}]} {
    %c0 = arith.constant 0 : index
    %c0_0 = arith.constant 0 : index
    %0 = vector.load %arg1[%c0, %c0_0] : memref<16x16xf32, #tpu.memory_space<vmem>>, vector<16x16xf32>
    %c0_1 = arith.constant 0 : index
    %c0_2 = arith.constant 0 : index
    %1 = vector.load %arg2[%c0_1, %c0_2] : memref<16x32xf32, #tpu.memory_space<vmem>>, vector<16x32xf32>
    %cst = arith.constant dense<0.000000e+00> : vector<16x32xf32>
    %2 = tpu.matmul %0, %1, %cst {dimension_numbers = #tpu.dot_dimension_numbers<[1], [0], [0], [1], [0, 0, 1, 1], [], []>} : vector<16x16xf32>, vector<16x32xf32>, vector<16x32xf32> -> vector<16x32xf32>
    %c0_3 = arith.constant 0 : index
    %c0_4 = arith.constant 0 : index
    %3 = vector.load %arg3[%c0_3, %c0_4] : memref<1x32xf32, #tpu.memory_space<vmem>>, vector<1x32xf32>
    %4 = vector.broadcast %3 : vector<1x32xf32> to vector<16x32xf32>
    %5 = arith.addf %2, %4 : vector<16x32xf32>
    %c0_5 = arith.constant 0 : index
    %c0_6 = arith.constant 0 : index
    %6 = vector.load %arg4[%c0_5, %c0_6] : memref<1x32xf32, #tpu.memory_space<vmem>>, vector<1x32xf32>
    %c0_7 = arith.constant 0 : index
    %c0_8 = arith.constant 0 : index
    %7 = vector.load %arg5[%c0_7, %c0_8] : memref<1x32xf32, #tpu.memory_space<vmem>>, vector<1x32xf32>
    %cst_9 = arith.constant dense<0.000000e+00> : vector<16xf32>
    %8 = vector.multi_reduction <add>, %5, %cst_9 [1] : vector<16x32xf32> to vector<16xf32>
    %9 = vector.shape_cast %8 : vector<16xf32> to vector<16x1xf32>
    %cst_10 = arith.constant 3.200000e+01 : f32
    %10 = vector.broadcast %cst_10 : f32 to vector<16x1xf32>
    %11 = arith.divf %9, %10 : vector<16x1xf32>
    %12 = vector.broadcast %11 : vector<16x1xf32> to vector<16x32xf32>
    %13 = arith.subf %5, %12 : vector<16x32xf32>
    %14 = arith.mulf %13, %13 : vector<16x32xf32>
    %cst_11 = arith.constant dense<0.000000e+00> : vector<16xf32>
    %15 = vector.multi_reduction <add>, %14, %cst_11 [1] : vector<16x32xf32> to vector<16xf32>
    %16 = vector.shape_cast %15 : vector<16xf32> to vector<16x1xf32>
    %cst_12 = arith.constant 3.200000e+01 : f32
    %17 = vector.broadcast %cst_12 : f32 to vector<16x1xf32>
    %18 = arith.divf %16, %17 : vector<16x1xf32>
    %cst_13 = arith.constant 9.99999974E-6 : f32
    %19 = vector.broadcast %cst_13 : f32 to vector<16x1xf32>
    %20 = arith.addf %18, %19 : vector<16x1xf32>
    %21 = math.rsqrt %20 : vector<16x1xf32>
    %22 = vector.broadcast %21 : vector<16x1xf32> to vector<16x32xf32>
    %23 = arith.mulf %13, %22 : vector<16x32xf32>
    %24 = vector.broadcast %6 : vector<1x32xf32> to vector<16x32xf32>
    %25 = arith.mulf %23, %24 : vector<16x32xf32>
    %26 = vector.broadcast %7 : vector<1x32xf32> to vector<16x32xf32>
    %27 = arith.addf %25, %26 : vector<16x32xf32>
    %cst_14 = arith.constant 0.000000e+00 : f32
    %28 = vector.broadcast %cst_14 : f32 to vector<16x32xf32>
    %29 = arith.maximumf %27, %28 : vector<16x32xf32>
    %c0_15 = arith.constant 0 : index
    %c0_16 = arith.constant 0 : index
    %30 = vector.load %arg6[%c0_15, %c0_16] : memref<32x32xf32, #tpu.memory_space<vmem>>, vector<32x32xf32>
    %cst_17 = arith.constant dense<0.000000e+00> : vector<16x32xf32>
    %31 = tpu.matmul %29, %30, %cst_17 {dimension_numbers = #tpu.dot_dimension_numbers<[1], [0], [0], [1], [0, 0, 1, 1], [], []>} : vector<16x32xf32>, vector<32x32xf32>, vector<16x32xf32> -> vector<16x32xf32>
    %c0_18 = arith.constant 0 : index
    %c0_19 = arith.constant 0 : index
    %32 = vector.load %arg7[%c0_18, %c0_19] : memref<1x32xf32, #tpu.memory_space<vmem>>, vector<1x32xf32>
    %33 = vector.broadcast %32 : vector<1x32xf32> to vector<16x32xf32>
    %34 = arith.addf %31, %33 : vector<16x32xf32>
    %c0_20 = arith.constant 0 : index
    %c0_21 = arith.constant 0 : index
    %35 = vector.load %arg8[%c0_20, %c0_21] : memref<1x32xf32, #tpu.memory_space<vmem>>, vector<1x32xf32>
    %c0_22 = arith.constant 0 : index
    %c0_23 = arith.constant 0 : index
    %36 = vector.load %arg9[%c0_22, %c0_23] : memref<1x32xf32, #tpu.memory_space<vmem>>, vector<1x32xf32>
    %cst_24 = arith.constant dense<0.000000e+00> : vector<16xf32>
    %37 = vector.multi_reduction <add>, %34, %cst_24 [1] : vector<16x32xf32> to vector<16xf32>
    %38 = vector.shape_cast %37 : vector<16xf32> to vector<16x1xf32>
    %cst_25 = arith.constant 3.200000e+01 : f32
    %39 = vector.broadcast %cst_25 : f32 to vector<16x1xf32>
    %40 = arith.divf %38, %39 : vector<16x1xf32>
    %41 = vector.broadcast %40 : vector<16x1xf32> to vector<16x32xf32>
    %42 = arith.subf %34, %41 : vector<16x32xf32>
    %43 = arith.mulf %42, %42 : vector<16x32xf32>
    %cst_26 = arith.constant dense<0.000000e+00> : vector<16xf32>
    %44 = vector.multi_reduction <add>, %43, %cst_26 [1] : vector<16x32xf32> to vector<16xf32>
    %45 = vector.shape_cast %44 : vector<16xf32> to vector<16x1xf32>
    %cst_27 = arith.constant 3.200000e+01 : f32
    %46 = vector.broadcast %cst_27 : f32 to vector<16x1xf32>
    %47 = arith.divf %45, %46 : vector<16x1xf32>
    %cst_28 = arith.constant 9.99999974E-6 : f32
    %48 = vector.broadcast %cst_28 : f32 to vector<16x1xf32>
    %49 = arith.addf %47, %48 : vector<16x1xf32>
    %50 = math.rsqrt %49 : vector<16x1xf32>
    %51 = vector.broadcast %50 : vector<16x1xf32> to vector<16x32xf32>
    %52 = arith.mulf %42, %51 : vector<16x32xf32>
    %53 = vector.broadcast %35 : vector<1x32xf32> to vector<16x32xf32>
    %54 = arith.mulf %52, %53 : vector<16x32xf32>
    %55 = vector.broadcast %36 : vector<1x32xf32> to vector<16x32xf32>
    %56 = arith.addf %54, %55 : vector<16x32xf32>
    %cst_29 = arith.constant 0.000000e+00 : f32
    %57 = vector.broadcast %cst_29 : f32 to vector<16x32xf32>
    %58 = arith.maximumf %56, %57 : vector<16x32xf32>
    %c0_30 = arith.constant 0 : index
    %c0_31 = arith.constant 0 : index
    %59 = vector.load %arg10[%c0_30, %c0_31] : memref<32x8xf32, #tpu.memory_space<vmem>>, vector<32x8xf32>
    %cst_32 = arith.constant dense<0.000000e+00> : vector<16x8xf32>
    %60 = tpu.matmul %58, %59, %cst_32 {dimension_numbers = #tpu.dot_dimension_numbers<[1], [0], [0], [1], [0, 0, 1, 1], [], []>} : vector<16x32xf32>, vector<32x8xf32>, vector<16x8xf32> -> vector<16x8xf32>
    %c0_33 = arith.constant 0 : index
    %c0_34 = arith.constant 0 : index
    %61 = vector.load %arg11[%c0_33, %c0_34] : memref<1x8xf32, #tpu.memory_space<vmem>>, vector<1x8xf32>
    %62 = vector.broadcast %61 : vector<1x8xf32> to vector<16x8xf32>
    %63 = arith.addf %60, %62 : vector<16x8xf32>
    %c0_35 = arith.constant 0 : index
    %c0_36 = arith.constant 0 : index
    %64 = vector.load %arg12[%c0_35, %c0_36] : memref<16x8xf32, #tpu.memory_space<vmem>>, vector<16x8xf32>
    tpu.vector_store %arg12[%c0_35, %c0_36], %63 {strides = array<i32>} : memref<16x8xf32, #tpu.memory_space<vmem>>, vector<16x8xf32>,
    return
  }
  func.func @transform_0(%arg0: i32) -> (i32, i32) {
    %c0_i32 = arith.constant 0 : i32
    %c0_i32_0 = arith.constant 0 : i32
    return %arg0, %c0_i32 : i32, i32
  }
  func.func @transform_1(%arg0: i32) -> (i32, i32) {
    %c0_i32 = arith.constant 0 : i32
    %c0_i32_0 = arith.constant 0 : i32
    %c0_i32_1 = arith.constant 0 : i32
    return %c0_i32, %c0_i32_0 : i32, i32
  }
  func.func @transform_2(%arg0: i32) -> (i32, i32) {
    %c0_i32 = arith.constant 0 : i32
    %c0_i32_0 = arith.constant 0 : i32
    %c0_i32_1 = arith.constant 0 : i32
    return %c0_i32, %c0_i32_0 : i32, i32
  }
  func.func @transform_3(%arg0: i32) -> (i32, i32) {
    %c0_i32 = arith.constant 0 : i32
    %c0_i32_0 = arith.constant 0 : i32
    %c0_i32_1 = arith.constant 0 : i32
    return %c0_i32, %c0_i32_0 : i32, i32
  }
  func.func @transform_4(%arg0: i32) -> (i32, i32) {
    %c0_i32 = arith.constant 0 : i32
    %c0_i32_0 = arith.constant 0 : i32
    %c0_i32_1 = arith.constant 0 : i32
    return %c0_i32, %c0_i32_0 : i32, i32
  }
  func.func @transform_5(%arg0: i32) -> (i32, i32) {
    %c0_i32 = arith.constant 0 : i32
    %c0_i32_0 = arith.constant 0 : i32
    %c0_i32_1 = arith.constant 0 : i32
    return %c0_i32, %c0_i32_0 : i32, i32
  }
  func.func @transform_6(%arg0: i32) -> (i32, i32) {
    %c0_i32 = arith.constant 0 : i32
    %c0_i32_0 = arith.constant 0 : i32
    %c0_i32_1 = arith.constant 0 : i32
    return %c0_i32, %c0_i32_0 : i32, i32
  }
  func.func @transform_7(%arg0: i32) -> (i32, i32) {
    %c0_i32 = arith.constant 0 : i32
    %c0_i32_0 = arith.constant 0 : i32
    %c0_i32_1 = arith.constant 0 : i32
    return %c0_i32, %c0_i32_0 : i32, i32
  }
  func.func @transform_8(%arg0: i32) -> (i32, i32) {
    %c0_i32 = arith.constant 0 : i32
    %c0_i32_0 = arith.constant 0 : i32
    %c0_i32_1 = arith.constant 0 : i32
    return %c0_i32, %c0_i32_0 : i32, i32
  }
  func.func @transform_9(%arg0: i32) -> (i32, i32) {
    %c0_i32 = arith.constant 0 : i32
    %c0_i32_0 = arith.constant 0 : i32
    %c0_i32_1 = arith.constant 0 : i32
    return %c0_i32, %c0_i32_0 : i32, i32
  }
  func.func @transform_10(%arg0: i32) -> (i32, i32) {
    %c0_i32 = arith.constant 0 : i32
    %c0_i32_0 = arith.constant 0 : i32
    %c0_i32_1 = arith.constant 0 : i32
    return %c0_i32, %c0_i32_0 : i32, i32
  }
  func.func @transform_11(%arg0: i32) -> (i32, i32) {
    %c0_i32 = arith.constant 0 : i32
    %c0_i32_0 = arith.constant 0 : i32
    return %arg0, %c0_i32 : i32, i32
  }
}

module attributes {stable_mosaic.version = 11 : i64} {
  func.func @mlp_kernel(%arg0: i32, %arg1: memref<16x16xf32, #tpu.memory_space<vmem>>, %arg2: memref<16x32xf32, #tpu.memory_space<vmem>>, %arg3: memref<1x32xf32, #tpu.memory_space<vmem>>, %arg4: memref<1x32xf32, #tpu.memory_space<vmem>>, %arg5: memref<1x32xf32, #tpu.memory_space<vmem>>, %arg6: memref<32x32xf32, #tpu.memory_space<vmem>>, %arg7: memref<1x32xf32, #tpu.memory_space<vmem>>, %arg8: memref<1x32xf32, #tpu.memory_space<vmem>>, %arg9: memref<1x32xf32, #tpu.memory_space<vmem>>, %arg10: memref<32x8xf32, #tpu.memory_space<vmem>>, %arg11: memref<1x8xf32, #tpu.memory_space<vmem>>, %arg12: memref<16x8xf32, #tpu.memory_space<vmem>>) attributes {dimension_semantics = [#tpu.dimension_semantics<parallel>], iteration_bounds = array<i64: 4>, scalar_prefetch = 0 : i64, scratch_operands = 0 : i64, tpu.core_type = #tpu.core_type<tc>, window_params = [{transform_indices = @transform_0, window_bounds = array<i64: 16, 16>}, {pipeline_mode = #tpu.pipeline_mode<synchronous>, transform_indices = @transform_1, window_bounds = array<i64: 16, 32>}, {pipeline_mode = #tpu.pipeline_mode<synchronous>, transform_indices = @transform_2, window_bounds = array<i64: 1, 32>}, {pipeline_mode = #tpu.pipeline_mode<synchronous>, transform_indices = @transform_3, window_bounds = array<i64: 1, 32>}, {pipeline_mode = #tpu.pipeline_mode<synchronous>, transform_indices = @transform_4, window_bounds = array<i64: 1, 32>}, {pipeline_mode = #tpu.pipeline_mode<synchronous>, transform_indices = @transform_5, window_bounds = array<i64: 32, 32>}, {pipeline_mode = #tpu.pipeline_mode<synchronous>, transform_indices = @transform_6, window_bounds = array<i64: 1, 32>}, {pipeline_mode = #tpu.pipeline_mode<synchronous>, transform_indices = @transform_7, window_bounds = array<i64: 1, 32>}, {pipeline_mode = #tpu.pipeline_mode<synchronous>, transform_indices = @transform_8, window_bounds = array<i64: 1, 32>}, {pipeline_mode = #tpu.pipeline_mode<synchronous>, transform_indices = @transform_9, window_bounds = array<i64: 32, 8>}, {pipeline_mode = #tpu.pipeline_mode<synchronous>, transform_indices = @transform_10, window_bounds = array<i64: 1, 8>}, {transform_indices = @transform_11, window_bounds = array<i64: 16, 8>}]} {
    %c0 = arith.constant 0 : index
    %c0_0 = arith.constant 0 : index
    %0 = vector.load %arg1[%c0, %c0_0] : memref<16x16xf32, #tpu.memory_space<vmem>>, vector<16x16xf32>
    %c0_1 = arith.constant 0 : index
    %c0_2 = arith.constant 0 : index
    %1 = vector.load %arg2[%c0_1, %c0_2] : memref<16x32xf32, #tpu.memory_space<vmem>>, vector<16x32xf32>
    %cst = arith.constant dense<0.000000e+00> : vector<16x32xf32>
    %2 = tpu.matmul %0, %1, %cst {dimension_numbers = #tpu.dot_dimension_numbers<[1], [0], [0], [1], [0, 0, 1, 1], [], []>} : vector<16x16xf32>, vector<16x32xf32>, vector<16x32xf32> -> vector<16x32xf32>
    %c0_3 = arith.constant 0 : index
    %c0_4 = arith.constant 0 : index
    %3 = vector.load %arg3[%c0_3, %c0_4] : memref<1x32xf32, #tpu.memory_space<vmem>>, vector<1x32xf32>
    %4 = vector.broadcast %3 : vector<1x32xf32> to vector<16x32xf32>
    %5 = arith.addf %2, %4 : vector<16x32xf32>
    %c0_5 = arith.constant 0 : index
    %c0_6 = arith.constant 0 : index
    %6 = vector.load %arg4[%c0_5, %c0_6] : memref<1x32xf32, #tpu.memory_space<vmem>>, vector<1x32xf32>
    %c0_7 = arith.constant 0 : index
    %c0_8 = arith.constant 0 : index
    %7 = vector.load %arg5[%c0_7, %c0_8] : memref<1x32xf32, #tpu.memory_space<vmem>>, vector<1x32xf32>
    %cst_9 = arith.constant dense<0.000000e+00> : vector<16xf32>
    %8 = vector.multi_reduction <add>, %5, %cst_9 [1] : vector<16x32xf32> to vector<16xf32>
    %9 = vector.shape_cast %8 : vector<16xf32> to vector<16x1xf32>
    %cst_10 = arith.constant 3.200000e+01 : f32
    %10 = vector.broadcast %cst_10 : f32 to vector<16x1xf32>
    %11 = arith.divf %9, %10 : vector<16x1xf32>
    %12 = vector.broadcast %11 : vector<16x1xf32> to vector<16x32xf32>
    %13 = arith.subf %5, %12 : vector<16x32xf32>
    %14 = arith.mulf %13, %13 : vector<16x32xf32>
    %cst_11 = arith.constant dense<0.000000e+00> : vector<16xf32>
    %15 = vector.multi_reduction <add>, %14, %cst_11 [1] : vector<16x32xf32> to vector<16xf32>
    %16 = vector.shape_cast %15 : vector<16xf32> to vector<16x1xf32>
    %cst_12 = arith.constant 3.200000e+01 : f32
    %17 = vector.broadcast %cst_12 : f32 to vector<16x1xf32>
    %18 = arith.divf %16, %17 : vector<16x1xf32>
    %cst_13 = arith.constant 9.99999974E-6 : f32
    %19 = vector.broadcast %cst_13 : f32 to vector<16x1xf32>
    %20 = arith.addf %18, %19 : vector<16x1xf32>
    %21 = math.rsqrt %20 : vector<16x1xf32>
    %22 = vector.broadcast %21 : vector<16x1xf32> to vector<16x32xf32>
    %23 = arith.mulf %13, %22 : vector<16x32xf32>
    %24 = vector.broadcast %6 : vector<1x32xf32> to vector<16x32xf32>
    %25 = arith.mulf %23, %24 : vector<16x32xf32>
    %26 = vector.broadcast %7 : vector<1x32xf32> to vector<16x32xf32>
    %27 = arith.addf %25, %26 : vector<16x32xf32>
    %cst_14 = arith.constant 0.000000e+00 : f32
    %28 = vector.broadcast %cst_14 : f32 to vector<16x32xf32>
    %29 = arith.maximumf %27, %28 : vector<16x32xf32>
    %c0_15 = arith.constant 0 : index
    %c0_16 = arith.constant 0 : index
    %30 = vector.load %arg6[%c0_15, %c0_16] : memref<32x32xf32, #tpu.memory_space<vmem>>, vector<32x32xf32>
    %cst_17 = arith.constant dense<0.000000e+00> : vector<16x32xf32>
    %31 = tpu.matmul %29, %30, %cst_17 {dimension_numbers = #tpu.dot_dimension_numbers<[1], [0], [0], [1], [0, 0, 1, 1], [], []>} : vector<16x32xf32>, vector<32x32xf32>, vector<16x32xf32> -> vector<16x32xf32>
    %c0_18 = arith.constant 0 : index
    %c0_19 = arith.constant 0 : index
    %32 = vector.load %arg7[%c0_18, %c0_19] : memref<1x32xf32, #tpu.memory_space<vmem>>, vector<1x32xf32>
    %33 = vector.broadcast %32 : vector<1x32xf32> to vector<16x32xf32>
    %34 = arith.addf %31, %33 : vector<16x32xf32>
    %c0_20 = arith.constant 0 : index
    %c0_21 = arith.constant 0 : index
    %35 = vector.load %arg8[%c0_20, %c0_21] : memref<1x32xf32, #tpu.memory_space<vmem>>, vector<1x32xf32>
    %c0_22 = arith.constant 0 : index
    %c0_23 = arith.constant 0 : index
    %36 = vector.load %arg9[%c0_22, %c0_23] : memref<1x32xf32, #tpu.memory_space<vmem>>, vector<1x32xf32>
    %cst_24 = arith.constant dense<0.000000e+00> : vector<16xf32>
    %37 = vector.multi_reduction <add>, %34, %cst_24 [1] : vector<16x32xf32> to vector<16xf32>
    %38 = vector.shape_cast %37 : vector<16xf32> to vector<16x1xf32>
    %cst_25 = arith.constant 3.200000e+01 : f32
    %39 = vector.broadcast %cst_25 : f32 to vector<16x1xf32>
    %40 = arith.divf %38, %39 : vector<16x1xf32>
    %41 = vector.broadcast %40 : vector<16x1xf32> to vector<16x32xf32>
    %42 = arith.subf %34, %41 : vector<16x32xf32>
    %43 = arith.mulf %42, %42 : vector<16x32xf32>
    %cst_26 = arith.constant dense<0.000000e+00> : vector<16xf32>
    %44 = vector.multi_reduction <add>, %43, %cst_26 [1] : vector<16x32xf32> to vector<16xf32>
    %45 = vector.shape_cast %44 : vector<16xf32> to vector<16x1xf32>
    %cst_27 = arith.constant 3.200000e+01 : f32
    %46 = vector.broadcast %cst_27 : f32 to vector<16x1xf32>
    %47 = arith.divf %45, %46 : vector<16x1xf32>
    %cst_28 = arith.constant 9.99999974E-6 : f32
    %48 = vector.broadcast %cst_28 : f32 to vector<16x1xf32>
    %49 = arith.addf %47, %48 : vector<16x1xf32>
    %50 = math.rsqrt %49 : vector<16x1xf32>
    %51 = vector.broadcast %50 : vector<16x1xf32> to vector<16x32xf32>
    %52 = arith.mulf %42, %51 : vector<16x32xf32>
    %53 = vector.broadcast %35 : vector<1x32xf32> to vector<16x32xf32>
    %54 = arith.mulf %52, %53 : vector<16x32xf32>
    %55 = vector.broadcast %36 : vector<1x32xf32> to vector<16x32xf32>
    %56 = arith.addf %54, %55 : vector<16x32xf32>
    %cst_29 = arith.constant 0.000000e+00 : f32
    %57 = vector.broadcast %cst_29 : f32 to vector<16x32xf32>
    %58 = arith.maximumf %56, %57 : vector<16x32xf32>
    %c0_30 = arith.constant 0 : index
    %c0_31 = arith.constant 0 : index
    %59 = vector.load %arg10[%c0_30, %c0_31] : memref<32x8xf32, #tpu.memory_space<vmem>>, vector<32x8xf32>
    %cst_32 = arith.constant dense<0.000000e+00> : vector<16x8xf32>
    %60 = tpu.matmul %58, %59, %cst_32 {dimension_numbers = #tpu.dot_dimension_numbers<[1], [0], [0], [1], [0, 0, 1, 1], [], []>} : vector<16x32xf32>, vector<32x8xf32>, vector<16x8xf32> -> vector<16x8xf32>
    %c0_33 = arith.constant 0 : index
    %c0_34 = arith.constant 0 : index
    %61 = vector.load %arg11[%c0_33, %c0_34] : memref<1x8xf32, #tpu.memory_space<vmem>>, vector<1x8xf32>
    %62 = vector.broadcast %61 : vector<1x8xf32> to vector<16x8xf32>
    %63 = arith.addf %60, %62 : vector<16x8xf32>
    %c0_35 = arith.constant 0 : index
    %c0_36 = arith.constant 0 : index
    %64 = vector.load %arg12[%c0_35, %c0_36] : memref<16x8xf32, #tpu.memory_space<vmem>>, vector<16x8xf32>
    tpu.vector_store %arg12[%c0_35, %c0_36], %63 {strides = array<i32>} : memref<16x8xf32, #tpu.memory_space<vmem>>, vector<16x8xf32>,
    return
  }
  func.func @transform_0(%arg0: i32) -> (i32, i32) {
    %c0_i32 = arith.constant 0 : i32
    %c0_i32_0 = arith.constant 0 : i32
    return %arg0, %c0_i32 : i32, i32
  }
  func.func @transform_1(%arg0: i32) -> (i32, i32) {
    %c0_i32 = arith.constant 0 : i32
    %c0_i32_0 = arith.constant 0 : i32
    %c0_i32_1 = arith.constant 0 : i32
    return %c0_i32, %c0_i32_0 : i32, i32
  }
  func.func @transform_2(%arg0: i32) -> (i32, i32) {
    %c0_i32 = arith.constant 0 : i32
    %c0_i32_0 = arith.constant 0 : i32
    %c0_i32_1 = arith.constant 0 : i32
    return %c0_i32, %c0_i32_0 : i32, i32
  }
  func.func @transform_3(%arg0: i32) -> (i32, i32) {
    %c0_i32 = arith.constant 0 : i32
    %c0_i32_0 = arith.constant 0 : i32
    %c0_i32_1 = arith.constant 0 : i32
    return %c0_i32, %c0_i32_0 : i32, i32
  }
  func.func @transform_4(%arg0: i32) -> (i32, i32) {
    %c0_i32 = arith.constant 0 : i32
    %c0_i32_0 = arith.constant 0 : i32
    %c0_i32_1 = arith.constant 0 : i32
    return %c0_i32, %c0_i32_0 : i32, i32
  }
  func.func @transform_5(%arg0: i32) -> (i32, i32) {
    %c0_i32 = arith.constant 0 : i32
    %c0_i32_0 = arith.constant 0 : i32
    %c0_i32_1 = arith.constant 0 : i32
    return %c0_i32, %c0_i32_0 : i32, i32
  }
  func.func @transform_6(%arg0: i32) -> (i32, i32) {
    %c0_i32 = arith.constant 0 : i32
    %c0_i32_0 = arith.constant 0 : i32
    %c0_i32_1 = arith.constant 0 : i32
    return %c0_i32, %c0_i32_0 : i32, i32
  }
  func.func @transform_7(%arg0: i32) -> (i32, i32) {
    %c0_i32 = arith.constant 0 : i32
    %c0_i32_0 = arith.constant 0 : i32
    %c0_i32_1 = arith.constant 0 : i32
    return %c0_i32, %c0_i32_0 : i32, i32
  }
  func.func @transform_8(%arg0: i32) -> (i32, i32) {
    %c0_i32 = arith.constant 0 : i32
    %c0_i32_0 = arith.constant 0 : i32
    %c0_i32_1 = arith.constant 0 : i32
    return %c0_i32, %c0_i32_0 : i32, i32
  }
  func.func @transform_9(%arg0: i32) -> (i32, i32) {
    %c0_i32 = arith.constant 0 : i32
    %c0_i32_0 = arith.constant 0 : i32
    %c0_i32_1 = arith.constant 0 : i32
    return %c0_i32, %c0_i32_0 : i32, i32
  }
  func.func @transform_10(%arg0: i32) -> (i32, i32) {
    %c0_i32 = arith.constant 0 : i32
    %c0_i32_0 = arith.constant 0 : i32
    %c0_i32_1 = arith.constant 0 : i32
    return %c0_i32, %c0_i32_0 : i32, i32
  }
  func.func @transform_11(%arg0: i32) -> (i32, i32) {
    %c0_i32 = arith.constant 0 : i32
    %c0_i32_0 = arith.constant 0 : i32
    return %arg0, %c0_i32 : i32, i32
  }
}

</mosaic_0001>

<bundles_post_ra>
// kernel: tpu_custom_call.1
= control target key start
LH: loop header
LB: loop body
LE: loop exit
PB: predicated region body
PF: predicated region fallthrough
CT: control target
= control target key end

     0   :  { %s993_s17 = smov 0   ;;  %s1080_s0 = inlined_call_operand.vmem [shape: f32[64,16], index: 0, kind: input, shape index: {}]   ;;  %s1081_s1 = inlined_call_operand.vmem [shape: f32[16,32], index: 1, kind: input, shape index: {}]   ;;  %s1082_s2 = inlined_call_operand.vmem [shape: f32[1,32], index: 2, kind: input, shape index: {}]   ;;  %s1083_s3 = inlined_call_operand.vmem [shape: f32[1,32], index: 3, kind: input, shape index: {}]   ;;  %s1084_s4 = inlined_call_operand.vmem [shape: f32[1,32], index: 4, kind: input, shape index: {}]   ;;  %s1085_s5 = inlined_call_operand.vmem [shape: f32[32,32], index: 5, kind: input, shape index: {}]   ;;  %s1086_s6 = inlined_call_operand.vmem [shape: f32[1,32], index: 6, kind: input, shape index: {}]   ;;  %s1087_s7 = inlined_call_operand.vmem [shape: f32[1,32], index: 7, kind: input, shape index: {}]   ;;  %s1088_s8 = inlined_call_operand.vmem [shape: f32[1,32], index: 8, kind: input, shape index: {}]   ;;  %s1089_s9 = inlined_call_operand.vmem [shape: f32[32,8], index: 9, kind: input, shape index: {}]   ;;  %s1090_s10 = inlined_call_operand.vmem [shape: f32[1,8], index: 10, kind: input, shape index: {}]   ;;  %s1091_s11 = inlined_call_operand.vmem [shape: f32[64,8], index: 11, kind: output, shape index: {}]  }
   0x1 LB: > { %s820_s18 = sadd.s32 4294967295, %s931_s17   ;;  %p824_p0 = scmp.ge.s32.totalorder %s931_s17, 1  ;;  %s931_s17 = sphi %s993_s17, %s21_s17  }
   0x2   : > { %p338_p1 = scmp.lt.s32.totalorder %s931_s17, 5 }
   0x4   : > { %p339_p2 = pnand %p824_p0, %p338_p1 }
   0x5   : > { %v392_v0 = vld [vmem:[%s1081_s1] sm:$0xff] (!%p339_p2)  ;;  %v393_v1 = vld [vmem:[%s1081_s1 + $0x8] sm:$0xff] (!%p339_p2)  ;;  %s825_s23 = sshll.u32 (!%p339_p2), %s820_s18, 1  ;;  %vm401_vm0 = vcmask (!%p339_p2), 130048   ;;  %vm485_vm1 = vcmask (!%p339_p2), 261120   ;;  %v533_v24 = vld [vmem:[%s1085_s5 + $0x10] sm:$0xff] (!%p339_p2) }
   0x6   : > { %342 = sbr.rel (%p339_p2) target bundleno = 1299 (0x513), region = 64  ;;  %v889_v2 = vpack.c.bf16 (!%p339_p2), %v393_v1, %v392_v0  ;;  %p379_p3 = scmp.lt.s32.totalorder (!%p339_p2), %s825_s23, 7  ;;  %v829_v5 = vld [vmem:[%s1082_s2] ss:$0 sm:$0xff] (!%p339_p2)  ;;  %v532_v23 = vld [vmem:[%s1085_s5 + $0x8] sm:$0xff] (!%p339_p2)  ;;  %v534_v26 = vld [vmem:[%s1085_s5 + $0x18] sm:$0xff] (!%p339_p2) }
   0x7   : > { %v531_v22 = vld [vmem:[%s1085_s5] sm:$0xff] (!%p339_p2)  ;;  %v897_v27 = vpack.c.bf16 (!%p339_p2), %v534_v26, %v533_v24  ;;  %v670_v0 = vld [vmem:[%s1089_s9 + $0x8] sm:$0xff] (!%p339_p2)  ;;  %vm761_vm2 = vcmask (!%p339_p2), 64512  }
   0x8   : > { %890 = vmatprep.subr.bf16.mxu0 (!%p339_p2), %v889_v2  ;;  %v893_v25 = vpack.c.bf16 (!%p339_p2), %v532_v23, %v531_v22  ;;  %v832_v35 = vld [vmem:[%s1083_s3] ss:$0 sm:$0xff] (!%p339_p2) }
   0x9   : > { %892 = vmatpush3.bf16.msra.mxu0 (!%p339_p2), %v889_v2  ;;  %v833_v37 = vld [vmem:[%s1084_s4] ss:$0 sm:$0xff] (!%p339_p2)  ;;  %v671_v2 = vld [vmem:[%s1089_s9 + $0x10] sm:$0xff] (!%p339_p2) }
   0xa   : > { %894 = vmatprep.subr.bf16.mxu1 (!%p339_p2), %v893_v25  ;;  %v834_v46 = vld [vmem:[%s1086_s6] ss:$0 sm:$0xff] (!%p339_p2) }
   0xb   : > { %896 = vmatpush3.bf16.msra.mxu1 (!%p339_p2), %v893_v25  ;;  %v669_v63 = vld [vmem:[%s1089_s9] sm:$0xff] (!%p339_p2) }
   0xc   : > { %898 = vmatprep.subr.bf16.mxu1 (!%p339_p2), %v897_v27  ;;  %v901_v1 = vpack.c.bf16 (!%p339_p2), %v670_v0, %v669_v63  ;;  %v839_v23 = vld [vmem:[%s1090_s10] ss:$0 sm:$0xff] (!%p339_p2) }
   0xd   : > { %s1093_s23 = smov (!%p379_p3, %s825_s23), 7 }
   0xe   : > { %s826_s24 = sshll.u32 %s1093_s23, 3  ;;  %902 = vmatprep.subr.bf16.mxu0 %v901_v1 }
   0xf   : > { %s382_s27 = scalar_lea.vmem %s1080_s0, %s826_s24  ;;  %900 = vmatpush3.bf16.msra.mxu1 %v897_v27  ;;  %s388_s28 = scalar_lea.vmem %s1091_s11, %s826_s24 }
  0x10   : > { %v390_v3 = vld [vmem:[%s382_s27] sm:$0xff]  ;;  %v391_v4 = vld [vmem:[%s382_s27 + $0x8] sm:$0xff] }
  0x11   : > { %864 = vmatprep.mubr.msk.f32.mxu0 %vm401_vm0, %v390_v3  ;;  %v672_v3 = vld [vmem:[%s1089_s9 + $0x18] sm:$0xff] }
  0x12   : > { %865 = vmatmul.mubr.msk.f32.vlgmr.msra.gmra.mrb[0].mxu0 %vm401_vm0, %v391_v4  ;;  %v905_v4 = vpack.c.bf16 %v672_v3, %v671_v2 }
  0x13   : > { %904 = vmatpush3.bf16.msra.mxu0 %v901_v1 }
  0x14   : > { %906 = vmatprep.subr.bf16.mxu0 %v905_v4 }
  0x17   : > { %908 = vmatpush3.bf16.msra.mxu0 %v905_v4 }
  0xe5   : > { %v866_v6 = vpop.f32.mrb[0].mxu0 }
  0xe6   : > { %v474_v7 = vpop.f32.mrb[1].mxu0  ;;  %v480_v9 = vadd.f32 %v866_v6, %v829_v5 }
  0xe7   : > { %v475_v8 = vadd.f32 %v829_v5, %v474_v7 }
  0xe8   : > { %v489_v11 = vsel %vm485_vm1, %v480_v9, 0.0 }
  0xe9   : > { %v486_v10 = vsel %vm485_vm1, %v475_v8, 0.0 }
  0xea   : > { %487 = vadd.xlane.f32.xlu0 %v486_v10 }
  0xee   : > { %490 = vadd.xlane.f32.xlu0 %v489_v11 }
 0x177   : > { %v488_v12 = vpop.xlane.xlu0 %487 }
 0x178   : > { %v493_v13 = vmul.f32 0.03125, %v488_v12  ;;  %v837_v12 = vld [vmem:[%s1087_s7] ss:$0 sm:$0xff] }
 0x17a   : > { %v495_v14 = vsub.f32 %v475_v8, %v493_v13 }
 0x17b   : > { %v491_v15 = vpop.xlane.xlu0 %490 }
 0x17c   : > { %v494_v16 = vmul.f32 0.03125, %v491_v15  ;;  %v497_v17 = vmul.f32 %v495_v14, %v495_v14 }
 0x17e   : > { %v496_v18 = vsub.f32 %v480_v9, %v494_v16  ;;  %v499_v19 = vsel %vm485_vm1, %v497_v17, 0.0  ;;  %v838_v16 = vld [vmem:[%s1088_s8] ss:$0 sm:$0xff] }
 0x17f   : > { %500 = vadd.xlane.f32.xlu1 %v499_v19 }
 0x180   : > { %v498_v20 = vmul.f32 %v496_v18, %v496_v18 }
 0x182   : > { %v502_v21 = vsel %vm485_vm1, %v498_v20, 0.0 }
 0x183   : > { %503 = vadd.xlane.f32.xlu1 %v502_v21 }
 0x20c   : > { %v501_v28 = vpop.xlane.xlu1 %500 }
 0x20d   : > { %v505_v29 = vmul.f32 0.03125, %v501_v28 }
 0x20f   : > { %v507_v30 = vadd.f32 1e-05, %v505_v29 }
 0x210   : > { %v504_v31 = vpop.xlane.xlu1 %503 }
 0x211   : > { %917 = vrsqrt.f32 %v507_v30  ;;  %v506_v32 = vmul.f32 0.03125, %v504_v31 }
 0x213   : > { %v508_v33 = vadd.f32 1e-05, %v506_v32 }
 0x215   : > { %919 = vrsqrt.f32 %v508_v33 }
 0x21b   : > { %v918_v34 = vpop.eup %917 }
 0x21c   : > { %v511_v36 = vmul.f32 %v918_v34, %v495_v14 }
 0x21e   : > { %v519_v38 = vmul.f32 %v832_v35, %v511_v36 }
 0x21f   : > { %v920_v39 = vpop.eup %919 }
 0x220   : > { %v512_v40 = vmul.f32 %v920_v39, %v496_v18  ;;  %v527_v41 = vadd.f32 %v833_v37, %v519_v38 }
 0x222   : > { %v520_v42 = vmul.f32 %v832_v35, %v512_v40  ;;  %v529_v43 = vmax.f32 %v527_v41, 0.0 }
 0x224   : > { %v528_v44 = vadd.f32 %v833_v37, %v520_v42  ;;  %875 = vmatprep.mubr.msk.f32.mxu1 %vm485_vm1, %v529_v43 }
 0x226   : > { %v530_v45 = vmax.f32 %v528_v44, 0.0 }
 0x228   : > { %876 = vmatmul.mubr.msk.f32.vlgmr.msra.gmra.mrb[0].mxu1 %vm485_vm1, %v530_v45 }
 0x2fb   : > { %v877_v47 = vpop.f32.mrb[0].mxu1 }
 0x2fc   : > { %v620_v48 = vadd.f32 %v877_v47, %v834_v46  ;;  %v614_v49 = vpop.f32.mrb[1].mxu1 }
 0x2fd   : > { %v615_v50 = vadd.f32 %v834_v46, %v614_v49 }
 0x2fe   : > { %v628_v51 = vsel %vm485_vm1, %v620_v48, 0.0 }
 0x2ff   : > { %629 = vadd.xlane.f32.xlu1 %v628_v51  ;;  %v625_v52 = vsel %vm485_vm1, %v615_v50, 0.0 }
 0x300   : > { %626 = vadd.xlane.f32.xlu0 %v625_v52 }
 0x38c   : > { %v630_v53 = vpop.xlane.xlu1 %629 }
 0x38d   : > { %v632_v54 = vmul.f32 0.03125, %v630_v53  ;;  %v627_v55 = vpop.xlane.xlu0 %626 }
 0x38e   : > { %v631_v56 = vmul.f32 0.03125, %v627_v55 }
 0x38f   : > { %v634_v57 = vsub.f32 %v620_v48, %v632_v54 }
 0x390   : > { %v633_v58 = vsub.f32 %v615_v50, %v631_v56 }
 0x391   : > { %v636_v59 = vmul.f32 %v634_v57, %v634_v57 }
 0x392   : > { %v635_v60 = vmul.f32 %v633_v58, %v633_v58 }
 0x393   : > { %v640_v61 = vsel %vm485_vm1, %v636_v59, 0.0 }
 0x394   : > { %641 = vadd.xlane.f32.xlu1 %v640_v61  ;;  %v637_v62 = vsel %vm485_vm1, %v635_v60, 0.0 }
 0x395   : > { %638 = vadd.xlane.f32.xlu0 %v637_v62 }
 0x421   : > { %v642_v5 = vpop.xlane.xlu1 %641 }
 0x422   : > { %v644_v6 = vmul.f32 0.03125, %v642_v5  ;;  %v639_v7 = vpop.xlane.xlu0 %638 }
 0x423   : > { %v643_v8 = vmul.f32 0.03125, %v639_v7 }
 0x424   : > { %v646_v9 = vadd.f32 1e-05, %v644_v6 }
 0x425   : > { %v645_v10 = vadd.f32 1e-05, %v643_v8 }
 0x426   : > { %921 = vrsqrt.f32 %v646_v9 }
 0x427   : > { %923 = vrsqrt.f32 %v645_v10 }
 0x430   : > { %v922_v11 = vpop.eup %921 }
 0x431   : > { %v924_v13 = vpop.eup %923  ;;  %v650_v14 = vmul.f32 %v922_v11, %v634_v57 }
 0x432   : > { %v649_v15 = vmul.f32 %v924_v13, %v633_v58 }
 0x433   : > { %v658_v17 = vmul.f32 %v837_v12, %v650_v14 }
 0x434   : > { %v657_v18 = vmul.f32 %v837_v12, %v649_v15 }
 0x435   : > { %v666_v19 = vadd.f32 %v838_v16, %v658_v17 }
 0x436   : > { %v665_v20 = vadd.f32 %v838_v16, %v657_v18 }
 0x437   : > { %v668_v22 = vmax.f32 %v666_v19, 0.0 }
 0x438   : > { %v667_v21 = vmax.f32 %v665_v20, 0.0 }
 0x43a   : > { %886 = vmatprep.mubr.msk.f32.mxu0 %vm485_vm1, %v667_v21 }
 0x43b   : > { %887 = vmatmul.mubr.msk.f32.vlgmr.msra.gmra.mrb[2].mxu0 %vm485_vm1, %v668_v22 }
 0x50e   : > { %v888_v24 = vpop.f32.mrb[2].mxu0 }
 0x50f   : > { %v752_v25 = vpop.f32.mrb[3].mxu0  ;;  %v758_v27 = vadd.f32 %v888_v24, %v839_v23 }
 0x510   : > { %v753_v26 = vadd.f32 %v839_v23, %v752_v25 }
 0x511   : > { %763 = vst.msk [vmem:[%s388_s28 + $0x8] sm:$0xff] %vm761_vm2, %v758_v27 }
 0x512   : > { %762 = vst.msk [vmem:[%s388_s28] sm:$0xff] %vm761_vm2, %v753_v26 }
 0x513 PF: > { %s21_s17 = sadd.s32 1, %s931_s17  }
 0x514   : > { %p18_p4 = scmp.ge.s32.totalorder %s21_s17, 6  }
 0x516   :  { %20 = sbr.rel (!%p18_p4) target bundleno = 1 (0x1), region = 94 }

// kernel: tpu_custom_call.1
= control target key start
LH: loop header
LB: loop body
LE: loop exit
PB: predicated region body
PF: predicated region fallthrough
CT: control target
= control target key end

     0   :  { %s993_s17 = smov 0   ;;  %s1080_s0 = inlined_call_operand.vmem [shape: f32[64,16], index: 0, kind: input, shape index: {}]   ;;  %s1081_s1 = inlined_call_operand.vmem [shape: f32[16,32], index: 1, kind: input, shape index: {}]   ;;  %s1082_s2 = inlined_call_operand.vmem [shape: f32[1,32], index: 2, kind: input, shape index: {}]   ;;  %s1083_s3 = inlined_call_operand.vmem [shape: f32[1,32], index: 3, kind: input, shape index: {}]   ;;  %s1084_s4 = inlined_call_operand.vmem [shape: f32[1,32], index: 4, kind: input, shape index: {}]   ;;  %s1085_s5 = inlined_call_operand.vmem [shape: f32[32,32], index: 5, kind: input, shape index: {}]   ;;  %s1086_s6 = inlined_call_operand.vmem [shape: f32[1,32], index: 6, kind: input, shape index: {}]   ;;  %s1087_s7 = inlined_call_operand.vmem [shape: f32[1,32], index: 7, kind: input, shape index: {}]   ;;  %s1088_s8 = inlined_call_operand.vmem [shape: f32[1,32], index: 8, kind: input, shape index: {}]   ;;  %s1089_s9 = inlined_call_operand.vmem [shape: f32[32,8], index: 9, kind: input, shape index: {}]   ;;  %s1090_s10 = inlined_call_operand.vmem [shape: f32[1,8], index: 10, kind: input, shape index: {}]   ;;  %s1091_s11 = inlined_call_operand.vmem [shape: f32[64,8], index: 11, kind: output, shape index: {}]  }
   0x1 LB: > { %s820_s18 = sadd.s32 4294967295, %s931_s17   ;;  %p824_p0 = scmp.ge.s32.totalorder %s931_s17, 1  ;;  %s931_s17 = sphi %s993_s17, %s21_s17  }
   0x2   : > { %p338_p1 = scmp.lt.s32.totalorder %s931_s17, 5 }
   0x4   : > { %p339_p2 = pnand %p824_p0, %p338_p1 }
   0x5   : > { %v392_v0 = vld [vmem:[%s1081_s1] sm:$0xff] (!%p339_p2)  ;;  %v393_v1 = vld [vmem:[%s1081_s1 + $0x8] sm:$0xff] (!%p339_p2)  ;;  %s825_s23 = sshll.u32 (!%p339_p2), %s820_s18, 1  ;;  %vm401_vm0 = vcmask (!%p339_p2), 130048   ;;  %vm485_vm1 = vcmask (!%p339_p2), 261120   ;;  %v533_v24 = vld [vmem:[%s1085_s5 + $0x10] sm:$0xff] (!%p339_p2) }
   0x6   : > { %342 = sbr.rel (%p339_p2) target bundleno = 1299 (0x513), region = 64  ;;  %v889_v2 = vpack.c.bf16 (!%p339_p2), %v393_v1, %v392_v0  ;;  %p379_p3 = scmp.lt.s32.totalorder (!%p339_p2), %s825_s23, 7  ;;  %v829_v5 = vld [vmem:[%s1082_s2] ss:$0 sm:$0xff] (!%p339_p2)  ;;  %v532_v23 = vld [vmem:[%s1085_s5 + $0x8] sm:$0xff] (!%p339_p2)  ;;  %v534_v26 = vld [vmem:[%s1085_s5 + $0x18] sm:$0xff] (!%p339_p2) }
   0x7   : > { %v531_v22 = vld [vmem:[%s1085_s5] sm:$0xff] (!%p339_p2)  ;;  %v897_v27 = vpack.c.bf16 (!%p339_p2), %v534_v26, %v533_v24  ;;  %v670_v0 = vld [vmem:[%s1089_s9 + $0x8] sm:$0xff] (!%p339_p2)  ;;  %vm761_vm2 = vcmask (!%p339_p2), 64512  }
   0x8   : > { %890 = vmatprep.subr.bf16.mxu0 (!%p339_p2), %v889_v2  ;;  %v893_v25 = vpack.c.bf16 (!%p339_p2), %v532_v23, %v531_v22  ;;  %v832_v35 = vld [vmem:[%s1083_s3] ss:$0 sm:$0xff] (!%p339_p2) }
   0x9   : > { %892 = vmatpush3.bf16.msra.mxu0 (!%p339_p2), %v889_v2  ;;  %v833_v37 = vld [vmem:[%s1084_s4] ss:$0 sm:$0xff] (!%p339_p2)  ;;  %v671_v2 = vld [vmem:[%s1089_s9 + $0x10] sm:$0xff] (!%p339_p2) }
   0xa   : > { %894 = vmatprep.subr.bf16.mxu1 (!%p339_p2), %v893_v25  ;;  %v834_v46 = vld [vmem:[%s1086_s6] ss:$0 sm:$0xff] (!%p339_p2) }
   0xb   : > { %896 = vmatpush3.bf16.msra.mxu1 (!%p339_p2), %v893_v25  ;;  %v669_v63 = vld [vmem:[%s1089_s9] sm:$0xff] (!%p339_p2) }
   0xc   : > { %898 = vmatprep.subr.bf16.mxu1 (!%p339_p2), %v897_v27  ;;  %v901_v1 = vpack.c.bf16 (!%p339_p2), %v670_v0, %v669_v63  ;;  %v839_v23 = vld [vmem:[%s1090_s10] ss:$0 sm:$0xff] (!%p339_p2) }
   0xd   : > { %s1093_s23 = smov (!%p379_p3, %s825_s23), 7 }
   0xe   : > { %s826_s24 = sshll.u32 %s1093_s23, 3  ;;  %902 = vmatprep.subr.bf16.mxu0 %v901_v1 }
   0xf   : > { %s382_s27 = scalar_lea.vmem %s1080_s0, %s826_s24  ;;  %900 = vmatpush3.bf16.msra.mxu1 %v897_v27  ;;  %s388_s28 = scalar_lea.vmem %s1091_s11, %s826_s24 }
  0x10   : > { %v390_v3 = vld [vmem:[%s382_s27] sm:$0xff]  ;;  %v391_v4 = vld [vmem:[%s382_s27 + $0x8] sm:$0xff] }
  0x11   : > { %864 = vmatprep.mubr.msk.f32.mxu0 %vm401_vm0, %v390_v3  ;;  %v672_v3 = vld [vmem:[%s1089_s9 + $0x18] sm:$0xff] }
  0x12   : > { %865 = vmatmul.mubr.msk.f32.vlgmr.msra.gmra.mrb[0].mxu0 %vm401_vm0, %v391_v4  ;;  %v905_v4 = vpack.c.bf16 %v672_v3, %v671_v2 }
  0x13   : > { %904 = vmatpush3.bf16.msra.mxu0 %v901_v1 }
  0x14   : > { %906 = vmatprep.subr.bf16.mxu0 %v905_v4 }
  0x17   : > { %908 = vmatpush3.bf16.msra.mxu0 %v905_v4 }
  0xe5   : > { %v866_v6 = vpop.f32.mrb[0].mxu0 }
  0xe6   : > { %v474_v7 = vpop.f32.mrb[1].mxu0  ;;  %v480_v9 = vadd.f32 %v866_v6, %v829_v5 }
  0xe7   : > { %v475_v8 = vadd.f32 %v829_v5, %v474_v7 }
  0xe8   : > { %v489_v11 = vsel %vm485_vm1, %v480_v9, 0.0 }
  0xe9   : > { %v486_v10 = vsel %vm485_vm1, %v475_v8, 0.0 }
  0xea   : > { %487 = vadd.xlane.f32.xlu0 %v486_v10 }
  0xee   : > { %490 = vadd.xlane.f32.xlu0 %v489_v11 }
 0x177   : > { %v488_v12 = vpop.xlane.xlu0 %487 }
 0x178   : > { %v493_v13 = vmul.f32 0.03125, %v488_v12  ;;  %v837_v12 = vld [vmem:[%s1087_s7] ss:$0 sm:$0xff] }
 0x17a   : > { %v495_v14 = vsub.f32 %v475_v8, %v493_v13 }
 0x17b   : > { %v491_v15 = vpop.xlane.xlu0 %490 }
 0x17c   : > { %v494_v16 = vmul.f32 0.03125, %v491_v15  ;;  %v497_v17 = vmul.f32 %v495_v14, %v495_v14 }
 0x17e   : > { %v496_v18 = vsub.f32 %v480_v9, %v494_v16  ;;  %v499_v19 = vsel %vm485_vm1, %v497_v17, 0.0  ;;  %v838_v16 = vld [vmem:[%s1088_s8] ss:$0 sm:$0xff] }
 0x17f   : > { %500 = vadd.xlane.f32.xlu1 %v499_v19 }
 0x180   : > { %v498_v20 = vmul.f32 %v496_v18, %v496_v18 }
 0x182   : > { %v502_v21 = vsel %vm485_vm1, %v498_v20, 0.0 }
 0x183   : > { %503 = vadd.xlane.f32.xlu1 %v502_v21 }
 0x20c   : > { %v501_v28 = vpop.xlane.xlu1 %500 }
 0x20d   : > { %v505_v29 = vmul.f32 0.03125, %v501_v28 }
 0x20f   : > { %v507_v30 = vadd.f32 1e-05, %v505_v29 }
 0x210   : > { %v504_v31 = vpop.xlane.xlu1 %503 }
 0x211   : > { %917 = vrsqrt.f32 %v507_v30  ;;  %v506_v32 = vmul.f32 0.03125, %v504_v31 }
 0x213   : > { %v508_v33 = vadd.f32 1e-05, %v506_v32 }
 0x215   : > { %919 = vrsqrt.f32 %v508_v33 }
 0x21b   : > { %v918_v34 = vpop.eup %917 }
 0x21c   : > { %v511_v36 = vmul.f32 %v918_v34, %v495_v14 }
 0x21e   : > { %v519_v38 = vmul.f32 %v832_v35, %v511_v36 }
 0x21f   : > { %v920_v39 = vpop.eup %919 }
 0x220   : > { %v512_v40 = vmul.f32 %v920_v39, %v496_v18  ;;  %v527_v41 = vadd.f32 %v833_v37, %v519_v38 }
 0x222   : > { %v520_v42 = vmul.f32 %v832_v35, %v512_v40  ;;  %v529_v43 = vmax.f32 %v527_v41, 0.0 }
 0x224   : > { %v528_v44 = vadd.f32 %v833_v37, %v520_v42  ;;  %875 = vmatprep.mubr.msk.f32.mxu1 %vm485_vm1, %v529_v43 }
 0x226   : > { %v530_v45 = vmax.f32 %v528_v44, 0.0 }
 0x228   : > { %876 = vmatmul.mubr.msk.f32.vlgmr.msra.gmra.mrb[0].mxu1 %vm485_vm1, %v530_v45 }
 0x2fb   : > { %v877_v47 = vpop.f32.mrb[0].mxu1 }
 0x2fc   : > { %v620_v48 = vadd.f32 %v877_v47, %v834_v46  ;;  %v614_v49 = vpop.f32.mrb[1].mxu1 }
 0x2fd   : > { %v615_v50 = vadd.f32 %v834_v46, %v614_v49 }
 0x2fe   : > { %v628_v51 = vsel %vm485_vm1, %v620_v48, 0.0 }
 0x2ff   : > { %629 = vadd.xlane.f32.xlu1 %v628_v51  ;;  %v625_v52 = vsel %vm485_vm1, %v615_v50, 0.0 }
 0x300   : > { %626 = vadd.xlane.f32.xlu0 %v625_v52 }
 0x38c   : > { %v630_v53 = vpop.xlane.xlu1 %629 }
 0x38d   : > { %v632_v54 = vmul.f32 0.03125, %v630_v53  ;;  %v627_v55 = vpop.xlane.xlu0 %626 }
 0x38e   : > { %v631_v56 = vmul.f32 0.03125, %v627_v55 }
 0x38f   : > { %v634_v57 = vsub.f32 %v620_v48, %v632_v54 }
 0x390   : > { %v633_v58 = vsub.f32 %v615_v50, %v631_v56 }
 0x391   : > { %v636_v59 = vmul.f32 %v634_v57, %v634_v57 }
 0x392   : > { %v635_v60 = vmul.f32 %v633_v58, %v633_v58 }
 0x393   : > { %v640_v61 = vsel %vm485_vm1, %v636_v59, 0.0 }
 0x394   : > { %641 = vadd.xlane.f32.xlu1 %v640_v61  ;;  %v637_v62 = vsel %vm485_vm1, %v635_v60, 0.0 }
 0x395   : > { %638 = vadd.xlane.f32.xlu0 %v637_v62 }
 0x421   : > { %v642_v5 = vpop.xlane.xlu1 %641 }
 0x422   : > { %v644_v6 = vmul.f32 0.03125, %v642_v5  ;;  %v639_v7 = vpop.xlane.xlu0 %638 }
 0x423   : > { %v643_v8 = vmul.f32 0.03125, %v639_v7 }
 0x424   : > { %v646_v9 = vadd.f32 1e-05, %v644_v6 }
 0x425   : > { %v645_v10 = vadd.f32 1e-05, %v643_v8 }
 0x426   : > { %921 = vrsqrt.f32 %v646_v9 }
 0x427   : > { %923 = vrsqrt.f32 %v645_v10 }
 0x430   : > { %v922_v11 = vpop.eup %921 }
 0x431   : > { %v924_v13 = vpop.eup %923  ;;  %v650_v14 = vmul.f32 %v922_v11, %v634_v57 }
 0x432   : > { %v649_v15 = vmul.f32 %v924_v13, %v633_v58 }
 0x433   : > { %v658_v17 = vmul.f32 %v837_v12, %v650_v14 }
 0x434   : > { %v657_v18 = vmul.f32 %v837_v12, %v649_v15 }
 0x435   : > { %v666_v19 = vadd.f32 %v838_v16, %v658_v17 }
 0x436   : > { %v665_v20 = vadd.f32 %v838_v16, %v657_v18 }
 0x437   : > { %v668_v22 = vmax.f32 %v666_v19, 0.0 }
 0x438   : > { %v667_v21 = vmax.f32 %v665_v20, 0.0 }
 0x43a   : > { %886 = vmatprep.mubr.msk.f32.mxu0 %vm485_vm1, %v667_v21 }
 0x43b   : > { %887 = vmatmul.mubr.msk.f32.vlgmr.msra.gmra.mrb[2].mxu0 %vm485_vm1, %v668_v22 }
 0x50e   : > { %v888_v24 = vpop.f32.mrb[2].mxu0 }
 0x50f   : > { %v752_v25 = vpop.f32.mrb[3].mxu0  ;;  %v758_v27 = vadd.f32 %v888_v24, %v839_v23 }
 0x510   : > { %v753_v26 = vadd.f32 %v839_v23, %v752_v25 }
 0x511   : > { %763 = vst.msk [vmem:[%s388_s28 + $0x8] sm:$0xff] %vm761_vm2, %v758_v27 }
 0x512   : > { %762 = vst.msk [vmem:[%s388_s28] sm:$0xff] %vm761_vm2, %v753_v26 }
 0x513 PF: > { %s21_s17 = sadd.s32 1, %s931_s17  }
 0x514   : > { %p18_p4 = scmp.ge.s32.totalorder %s21_s17, 6  }
 0x516   :  { %20 = sbr.rel (!%p18_p4) target bundleno = 1 (0x1), region = 94 }

</bundles_post_ra>
